<compile_context>
chip_gen: v7x
topology: tpu7x:2x2x1
jax: 0.10.0
libtpu: 0.0.40
codegen_flags: <defaults>
</compile_context>

<pallas_src>
import functools

import jax
import jax.numpy as jnp
from jax import lax
from jax.experimental import pallas as pl
from jax.experimental.pallas import tpu as pltpu


def _round_up(x, m):
    return ((x + m - 1) // m) * m


def _fc_residual_kernel(x_ref, w1_ref, b1_ref, w2_ref, b2_ref, o_ref, *, apply_relu):
    """One (tm, D) row tile: out = x + expand(nonlin(bottleneck(x)))."""
    x = x_ref[...]

    # Bottleneck: x (tm, D) contracted against W1 kept in PyTorch (out, in) layout,
    # i.e. x @ W1.T directly on the MXU (no weight-transpose pass over HBM).
    y = lax.dot_general(
        x, w1_ref[...],
        dimension_numbers=(((1,), (1,)), ((), ())),
        preferred_element_type=jnp.float32)
    y = y + b1_ref[...]
    if apply_relu:
        y = jnp.maximum(y, 0.0)

    # Keep the expand matmul in the parameter dtype (bf16 on bf16 models) so the
    # MXU runs at full rate; accumulation stays f32 via preferred_element_type.
    y = y.astype(w2_ref.dtype)
    z = lax.dot_general(
        y, w2_ref[...],
        dimension_numbers=(((1,), (1,)), ((), ())),
        preferred_element_type=jnp.float32)
    z = z + b2_ref[...]

    # Residual add in f32, cast back to the output dtype.
    o_ref[...] = (x.astype(jnp.float32) + z).astype(o_ref.dtype)


# Sized against v7x's 64 MiB VMEM with headroom (also fine on v5e/v6e's 128 MiB).
_VMEM_BUDGET = 48 * 1024 * 1024


def _pick_tm(tm_req, N, D, Dp, x_bytes, p_bytes):
    """Largest multiple-of-8 row tile <= tm_req that fits the VMEM budget."""
    tm = max(8, min(_round_up(tm_req, 8), _round_up(N, 8)))

    def est(t):
        tiles = 2 * 2 * t * D * x_bytes                      # x + out, double-buffered
        y_tmp = 2 * t * Dp * 4                               # f32 intermediate headroom
        w = 2 * ((Dp * D + D * Dp) * p_bytes + (Dp + D) * p_bytes)
        return tiles + y_tmp + w

    while tm > 8 and est(tm) > _VMEM_BUDGET:
        tm = max(8, _round_up(tm // 2, 8))
    return tm, est(tm)


def fc_residual_block(x, w_bottleneck, b_bottleneck, w_expand, b_expand,
                      *, non_lin_is_relu=False, tm=512):
    """Pallas forward of FCResidualBlock.

    x:             (N, D)
    w_bottleneck:  (Dsmall, D)   -- PyTorch Linear weight layout (out, in)
    b_bottleneck:  (Dsmall,)
    w_expand:      (D, Dsmall)   -- PyTorch Linear weight layout (out, in)
    b_expand:      (D,)
    """
    N, D = x.shape
    Dsmall = w_bottleneck.shape[0]
    out_dtype = x.dtype

    # --- glue: lane-pad the bottleneck width to a multiple of 128 lanes --------
    Dp = max(_round_up(Dsmall, 128), 128)
    if Dp != Dsmall:
        w1 = jnp.pad(w_bottleneck, ((0, Dp - Dsmall), (0, 0)))
        b1 = jnp.pad(b_bottleneck, (0, Dp - Dsmall))
        w2 = jnp.pad(w_expand, ((0, 0), (0, Dp - Dsmall)))
    else:
        w1, b1, w2 = w_bottleneck, b_bottleneck, w_expand
    b1 = b1.reshape(1, Dp)
    b2 = b_expand.reshape(1, D)

    # --- tiling: large row tiles, sized against VMEM, ragged N padded ----------
    tm, vmem_est = _pick_tm(tm, N, D, Dp, x.dtype.itemsize, w1.dtype.itemsize)
    N_pad = _round_up(N, tm)
    x_in = jnp.pad(x, ((0, N_pad - N), (0, 0))) if N_pad != N else x

    grid = (N_pad // tm,)
    kernel = functools.partial(_fc_residual_kernel, apply_relu=non_lin_is_relu)

    flops = 4 * N_pad * D * Dp + 2 * N_pad * D
    bytes_accessed = (2 * N_pad * D * x.dtype.itemsize
                      + (2 * Dp * D + Dp + D) * w1.dtype.itemsize)
    vmem_limit = int(min(max(vmem_est + (4 << 20), 32 << 20), 56 << 20))

    out = pl.pallas_call(
        kernel,
        out_shape=jax.ShapeDtypeStruct((N_pad, D), out_dtype),
        grid_spec=pltpu.PrefetchScalarGridSpec(
            num_scalar_prefetch=0,
            grid=grid,
            in_specs=[
                pl.BlockSpec((tm, D), lambda i: (i, 0)),      # x tile
                pl.BlockSpec((Dp, D), lambda i: (0, 0)),      # W1 (out, in), full
                pl.BlockSpec((1, Dp), lambda i: (0, 0)),      # b1, lane-padded
                pl.BlockSpec((D, Dp), lambda i: (0, 0)),      # W2 (out, in), full
                pl.BlockSpec((1, D), lambda i: (0, 0)),       # b2
            ],
            out_specs=pl.BlockSpec((tm, D), lambda i: (i, 0)),
        ),
        compiler_params=pltpu.CompilerParams(
            dimension_semantics=("parallel",),
            vmem_limit_bytes=vmem_limit),
        cost_estimate=pl.CostEstimate(
            flops=flops, transcendentals=0, bytes_accessed=bytes_accessed),
    )(x_in, w1, b1, w2, b2)

    return out[:N] if N_pad != N else out


def _reference(x, w1, b1, w2, b2, non_lin_is_relu):
    y = x @ w1.T + b1
    if non_lin_is_relu:
        y = jnp.maximum(y, 0.0)
    y = y @ w2.T + b2
    return x + y


if __name__ == "__main__":
    key = jax.random.PRNGKey(0)
    N, D, Dsmall = 16, 32, 8

    k_x, k_w1, k_b1, k_w2, k_b2 = jax.random.split(key, 5)

    # Deterministic parameter init (PyTorch-Linear-style uniform bounds).
    bound1 = 1.0 / (D ** 0.5)
    bound2 = 1.0 / (Dsmall ** 0.5)
    w_bottleneck = jax.random.uniform(k_w1, (Dsmall, D), jnp.float32, -bound1, bound1)
    b_bottleneck = jax.random.uniform(k_b1, (Dsmall,),  jnp.float32, -bound1, bound1)
    w_expand     = jax.random.uniform(k_w2, (D, Dsmall), jnp.float32, -bound2, bound2)
    b_expand     = jax.random.uniform(k_b2, (D,),        jnp.float32, -bound2, bound2)

    x = jax.random.normal(k_x, (N, D), jnp.float32)

    # Case 1: non_lin=None (module default).
    out_none = fc_residual_block(x, w_bottleneck, b_bottleneck, w_expand, b_expand,
                                 non_lin_is_relu=False)
    # Case 2: non_lin=ReLU.
    out_relu = fc_residual_block(x, w_bottleneck, b_bottleneck, w_expand, b_expand,
                                 non_lin_is_relu=True)
    # Case 3: ragged batch (N not a multiple of the tile) exercises the padding path.
    x_rag = x[:13]
    out_rag = fc_residual_block(x_rag, w_bottleneck, b_bottleneck, w_expand, b_expand,
                                non_lin_is_relu=True)
    # Case 4: bf16 activations/params (expand matmul runs in bf16, f32 accumulate).
    out_bf16 = fc_residual_block(x.astype(jnp.bfloat16),
                                 w_bottleneck.astype(jnp.bfloat16),
                                 b_bottleneck.astype(jnp.bfloat16),
                                 w_expand.astype(jnp.bfloat16),
                                 b_expand.astype(jnp.bfloat16),
                                 non_lin_is_relu=True)

    jax.block_until_ready((out_none, out_relu, out_rag, out_bf16))

    ref_none = _reference(x, w_bottleneck, b_bottleneck, w_expand, b_expand, False)
    ref_relu = _reference(x, w_bottleneck, b_bottleneck, w_expand, b_expand, True)
    assert out_none.shape == (N, D) and out_relu.shape == (N, D)
    assert jnp.allclose(out_none, ref_none, atol=1e-5, rtol=1e-5)
    assert jnp.allclose(out_relu, ref_relu, atol=1e-5, rtol=1e-5)
    assert out_rag.shape == (13, D)
    assert jnp.allclose(out_rag, ref_relu[:13], atol=1e-5, rtol=1e-5)
    assert out_bf16.shape == (N, D)
    assert jnp.allclose(out_bf16.astype(jnp.float32), ref_relu, atol=1e-1, rtol=1e-1)

    print("KERNEL_OK")
</pallas_src>

<mosaic_0001>
module attributes {stable_mosaic.version = 11 : i64} {
  func.func @_fc_residual_kernel(%arg0: i32, %arg1: memref<16x32xf32, #tpu.memory_space<vmem>>, %arg2: memref<128x32xf32, #tpu.memory_space<vmem>>, %arg3: memref<1x128xf32, #tpu.memory_space<vmem>>, %arg4: memref<32x128xf32, #tpu.memory_space<vmem>>, %arg5: memref<1x32xf32, #tpu.memory_space<vmem>>, %arg6: memref<16x32xf32, #tpu.memory_space<vmem>>) attributes {dimension_semantics = [#tpu.dimension_semantics<parallel>], iteration_bounds = array<i64: 1>, scalar_prefetch = 0 : i64, scratch_operands = 0 : i64, tpu.core_type = #tpu.core_type<tc>, window_params = [{transform_indices = @transform_0, window_bounds = array<i64: 16, 32>}, {pipeline_mode = #tpu.pipeline_mode<synchronous>, transform_indices = @transform_1, window_bounds = array<i64: 128, 32>}, {pipeline_mode = #tpu.pipeline_mode<synchronous>, transform_indices = @transform_2, window_bounds = array<i64: 1, 128>}, {pipeline_mode = #tpu.pipeline_mode<synchronous>, transform_indices = @transform_3, window_bounds = array<i64: 32, 128>}, {pipeline_mode = #tpu.pipeline_mode<synchronous>, transform_indices = @transform_4, window_bounds = array<i64: 1, 32>}, {transform_indices = @transform_5, window_bounds = array<i64: 16, 32>}]} {
    %c0 = arith.constant 0 : index
    %c0_0 = arith.constant 0 : index
    %0 = vector.load %arg1[%c0, %c0_0] : memref<16x32xf32, #tpu.memory_space<vmem>>, vector<16x32xf32>
    %c0_1 = arith.constant 0 : index
    %c0_2 = arith.constant 0 : index
    %1 = vector.load %arg2[%c0_1, %c0_2] : memref<128x32xf32, #tpu.memory_space<vmem>>, vector<128x32xf32>
    %cst = arith.constant dense<0.000000e+00> : vector<16x128xf32>
    %2 = tpu.matmul %0, %1, %cst {dimension_numbers = #tpu.dot_dimension_numbers<[1], [1], [0], [0], [0, 0, 1, 0], [], []>} : vector<16x32xf32>, vector<128x32xf32>, vector<16x128xf32> -> vector<16x128xf32>
    %c0_3 = arith.constant 0 : index
    %c0_4 = arith.constant 0 : index
    %3 = vector.load %arg3[%c0_3, %c0_4] : memref<1x128xf32, #tpu.memory_space<vmem>>, vector<1x128xf32>
    %4 = vector.broadcast %3 : vector<1x128xf32> to vector<16x128xf32>
    %5 = arith.addf %2, %4 : vector<16x128xf32>
    %c0_5 = arith.constant 0 : index
    %c0_6 = arith.constant 0 : index
    %6 = vector.load %arg4[%c0_5, %c0_6] : memref<32x128xf32, #tpu.memory_space<vmem>>, vector<32x128xf32>
    %cst_7 = arith.constant dense<0.000000e+00> : vector<16x32xf32>
    %7 = tpu.matmul %5, %6, %cst_7 {dimension_numbers = #tpu.dot_dimension_numbers<[1], [1], [0], [0], [0, 0, 1, 0], [], []>} : vector<16x128xf32>, vector<32x128xf32>, vector<16x32xf32> -> vector<16x32xf32>
    %c0_8 = arith.constant 0 : index
    %c0_9 = arith.constant 0 : index
    %8 = vector.load %arg5[%c0_8, %c0_9] : memref<1x32xf32, #tpu.memory_space<vmem>>, vector<1x32xf32>
    %9 = vector.broadcast %8 : vector<1x32xf32> to vector<16x32xf32>
    %10 = arith.addf %7, %9 : vector<16x32xf32>
    %11 = arith.addf %0, %10 : vector<16x32xf32>
    %c0_10 = arith.constant 0 : index
    %c0_11 = arith.constant 0 : index
    %12 = vector.load %arg6[%c0_10, %c0_11] : memref<16x32xf32, #tpu.memory_space<vmem>>, vector<16x32xf32>
    tpu.vector_store %arg6[%c0_10, %c0_11], %11 {strides = array<i32>} : memref<16x32xf32, #tpu.memory_space<vmem>>, vector<16x32xf32>,
    return
  }
  func.func @transform_0(%arg0: i32) -> (i32, i32) {
    %c0_i32 = arith.constant 0 : i32
    %c0_i32_0 = arith.constant 0 : i32
    return %arg0, %c0_i32 : i32, i32
  }
  func.func @transform_1(%arg0: i32) -> (i32, i32) {
    %c0_i32 = arith.constant 0 : i32
    %c0_i32_0 = arith.constant 0 : i32
    %c0_i32_1 = arith.constant 0 : i32
    return %c0_i32, %c0_i32_0 : i32, i32
  }
  func.func @transform_2(%arg0: i32) -> (i32, i32) {
    %c0_i32 = arith.constant 0 : i32
    %c0_i32_0 = arith.constant 0 : i32
    %c0_i32_1 = arith.constant 0 : i32
    return %c0_i32, %c0_i32_0 : i32, i32
  }
  func.func @transform_3(%arg0: i32) -> (i32, i32) {
    %c0_i32 = arith.constant 0 : i32
    %c0_i32_0 = arith.constant 0 : i32
    %c0_i32_1 = arith.constant 0 : i32
    return %c0_i32, %c0_i32_0 : i32, i32
  }
  func.func @transform_4(%arg0: i32) -> (i32, i32) {
    %c0_i32 = arith.constant 0 : i32
    %c0_i32_0 = arith.constant 0 : i32
    %c0_i32_1 = arith.constant 0 : i32
    return %c0_i32, %c0_i32_0 : i32, i32
  }
  func.func @transform_5(%arg0: i32) -> (i32, i32) {
    %c0_i32 = arith.constant 0 : i32
    %c0_i32_0 = arith.constant 0 : i32
    return %arg0, %c0_i32 : i32, i32
  }
}

</mosaic_0001>

<bundles_post_ra>
// kernel: tpu_custom_call.1
= control target key start
LH: loop header
LB: loop body
LE: loop exit
PB: predicated region body
PF: predicated region fallthrough
CT: control target
= control target key end

     0   :  { %vm46_vm0 = vcmask 261120   ;;  %s614_s0 = inlined_call_operand.vmem [shape: f32[16,32], index: 0, kind: input, shape index: {}]   ;;  %s615_s1 = inlined_call_operand.vmem [shape: f32[128,32], index: 1, kind: input, shape index: {}]   ;;  %s616_s2 = inlined_call_operand.vmem [shape: f32[1,128], index: 2, kind: input, shape index: {}]   ;;  %s617_s3 = inlined_call_operand.vmem [shape: f32[32,128], index: 3, kind: input, shape index: {}]   ;;  %s618_s4 = inlined_call_operand.vmem [shape: f32[1,32], index: 4, kind: input, shape index: {}]   ;;  %s619_s5 = inlined_call_operand.hbm [shape: f32[16,32], index: 5, kind: output, shape index: {}]  }
   0x1   :  { %v23_v0 = vld [vmem:[%s615_s1] sm:$0xff]  ;;  %v24_v1 = vld [vmem:[%s615_s1 + $0x8] sm:$0xff]  ;;  %v25_v2 = vld [vmem:[%s615_s1 + $0x10] sm:$0xff] }
   0x2   :  { %v372_v3 = vpack.c.bf16 %v24_v1, %v23_v0  ;;  %vm499_vm1 = vmpackc.low %vm46_vm0, %vm46_vm0  ;;  %v26_v5 = vld [vmem:[%s615_s1 + $0x18] sm:$0xff]  ;;  %v27_v7 = vld [vmem:[%s615_s1 + $0x20] sm:$0xff] }
   0x3   :  { %v378_v6 = vpack.c.bf16 %v26_v5, %v25_v2  ;;  %v21_v8 = vld [vmem:[%s614_s0] sm:$0xff]  ;;  %v28_v9 = vld [vmem:[%s615_s1 + $0x28] sm:$0xff]  ;;  %v178_v13 = vld [vmem:[%s617_s3 + $0x10] sm:$0xff] }
   0x4   :  { %374 = vmatprep.subr.msk.bf16.mxu0 %vm499_vm1, %v372_v3  ;;  %358 = vmatprep.mubr.msk.f32.mxu0 %vm46_vm0, %v21_v8  ;;  %v176_v10 = vld [vmem:[%s617_s3] sm:$0xff]  ;;  %v177_v11 = vld [vmem:[%s617_s3 + $0x8] sm:$0xff]  ;;  %v179_v14 = vld [vmem:[%s617_s3 + $0x18] sm:$0xff] }
   0x5   :  { %377 = vmatpush3.bf16.xpose.msk.msra.mxu0 %vm499_vm1, %v372_v3  ;;  %v420_v12 = vpack.c.bf16 %v177_v11, %v176_v10 }
   0x6   :  { %380 = vmatprep.subr.msk.bf16.mxu0 %vm499_vm1, %v378_v6 }
   0x7   :  { %10 = vsyncpa [#allocation3], 0  ;;  %v424_v15 = vpack.c.bf16 %v179_v14, %v178_v13  ;;  %v384_v16 = vpack.c.bf16 %v28_v9, %v27_v7  ;;  %421 = vmatprep.subr.bf16.mxu1 %v420_v12  ;;  %v29_v17 = vld [vmem:[%s615_s1 + $0x30] sm:$0xff]  ;;  %v30_v18 = vld [vmem:[%s615_s1 + $0x38] sm:$0xff]  ;;  %s455_s14 = smov [#allocation2]  }
   0x8   :  { %423 = vmatpush3.bf16.xpose.msra.mxu1 %v420_v12  ;;  %v390_v19 = vpack.c.bf16 %v30_v18, %v29_v17  ;;  %v31_v20 = vld [vmem:[%s615_s1 + $0x40] sm:$0xff]  ;;  %v32_v21 = vld [vmem:[%s615_s1 + $0x48] sm:$0xff]  ;;  %v33_v23 = vld [vmem:[%s615_s1 + $0x50] sm:$0xff]  ;;  %s271_s15 = sshll.u32 %s455_s14, 4  ;;  %s272_s15 = int_to_ptr.vmem [resolvable:$true] %s271_s15 }
   0x9   :  { %425 = vmatprep.subr.bf16.mxu1 %v424_v15  ;;  %v396_v22 = vpack.c.bf16 %v32_v21, %v31_v20  ;;  %v34_v24 = vld [vmem:[%s615_s1 + $0x58] sm:$0xff]  ;;  %v35_v26 = vld [vmem:[%s615_s1 + $0x60] sm:$0xff]  ;;  %v36_v27 = vld [vmem:[%s615_s1 + $0x68] sm:$0xff]  ;;  %p436_p1 = scmp.lt.s32.totalorder %s272_s15, %s272_s15 }
   0xa   :  { %v402_v25 = vpack.c.bf16 %v34_v24, %v33_v23  ;;  %v408_v28 = vpack.c.bf16 %v36_v27, %v35_v26  ;;  %v37_v29 = vld [vmem:[%s615_s1 + $0x70] sm:$0xff]  ;;  %v38_v30 = vld [vmem:[%s615_s1 + $0x78] sm:$0xff]  ;;  %v22_v32 = vld [vmem:[%s614_s0 + $0x8] sm:$0xff]  ;;  %s431_s0 = scalar_lea.vmem %s272_s15, 256 }
   0xb   :  { %v414_v31 = vpack.c.bf16 %v38_v30, %v37_v29  ;;  %v282_v33 = vld [vmem:[%s616_s2] ss:$0 sm:$0xff]  ;;  %p432_p0 = scmp.ne.s32.totalorder %s272_s15, %s431_s0  ;;  %p437_p2 = scmp.lt.s32.totalorder %s431_s0, %s431_s0 }
   0xc   :  { %v301_v38 = vld [vmem:[%s618_s4] ss:$0 sm:$0xff] }
   0xd   :  { %383 = vmatpush3.bf16.xpose.msk.msra.mxu0 %vm499_vm1, %v378_v6  ;;  %p438_p3 = por %p437_p2, %p436_p1 }
   0xe   :  { %386 = vmatprep.subr.msk.bf16.mxu0 %vm499_vm1, %v384_v16 }
   0xf   :  { %p439_p4 = pnand %p438_p3, %p432_p0 }
  0x10   :  { %427 = vmatpush3.bf16.xpose.msra.mxu1 %v424_v15 }
  0x15   :  { %389 = vmatpush3.bf16.xpose.msk.msra.mxu0 %vm499_vm1, %v384_v16 }
  0x16   :  { %392 = vmatprep.subr.msk.bf16.mxu0 %vm499_vm1, %v390_v19 }
  0x1d   :  { %395 = vmatpush3.bf16.xpose.msk.msra.mxu0 %vm499_vm1, %v390_v19 }
  0x1e   :  { %398 = vmatprep.subr.msk.bf16.mxu0 %vm499_vm1, %v396_v22 }
  0x25   :  { %401 = vmatpush3.bf16.xpose.msk.msra.mxu0 %vm499_vm1, %v396_v22 }
  0x26   :  { %404 = vmatprep.subr.msk.bf16.mxu0 %vm499_vm1, %v402_v25 }
  0x2d   :  { %407 = vmatpush3.bf16.xpose.msk.msra.mxu0 %vm499_vm1, %v402_v25 }
  0x2e   :  { %410 = vmatprep.subr.msk.bf16.mxu0 %vm499_vm1, %v408_v28 }
  0x35   :  { %413 = vmatpush3.bf16.xpose.msk.msra.mxu0 %vm499_vm1, %v408_v28 }
  0x36   :  { %416 = vmatprep.subr.msk.bf16.mxu0 %vm499_vm1, %v414_v31 }
  0x3d   :  { %419 = vmatpush3.bf16.xpose.msk.msra.mxu0 %vm499_vm1, %v414_v31 }
  0x44   :  { %359 = vmatmul.mubr.msk.f32.vlgmr.msra.gmra.mrb[0].mxu0 %vm46_vm0, %v22_v32 }
 0x117   :  { %v360_v34 = vpop.f32.mrb[0].mxu0 }
 0x118   :  { %v167_v35 = vpop.f32.mrb[1].mxu0  ;;  %v173_v37 = vadd.f32 %v360_v34, %v282_v33 }
 0x119   :  { %v168_v36 = vadd.f32 %v282_v33, %v167_v35 }
 0x11b   :  { %369 = vmatprep.mubr.f32.mxu1 %v168_v36 }
 0x11c   :  { %370 = vmatmul.mubr.f32.vlgmr.msra.gmra.mrb[0].mxu1 %v173_v37 }
 0x1ef   :  { %v371_v39 = vpop.f32.mrb[0].mxu1 }
 0x1f0   :  { %v259_v40 = vadd.f32 %v371_v39, %v301_v38  ;;  %v253_v41 = vpop.f32.mrb[1].mxu1 }
 0x1f1   :  { %v254_v42 = vadd.f32 %v301_v38, %v253_v41 }
 0x1f2   :  { %v263_v43 = vadd.f32 %v259_v40, %v22_v32 }
 0x1f3   :  { %v262_v44 = vadd.f32 %v254_v42, %v21_v8 }
 0x1f4   :  { %265 = vst.msk [vmem:[#allocation2 + $0x8] sm:$0xff] %vm46_vm0, %v263_v43 }
 0x1f5   :  { %264 = vst.msk [vmem:[#allocation2] sm:$0xff] %vm46_vm0, %v262_v44 }
 0x1f6   :  { %442 = shalt.err (!%p439_p4)
}
 0x1f7   :  { %s443_s16 = scalar_lea.hbm %s619_s5, 256 }
 0x1f8   :  { %p444_p5 = scmp.ne.s32.totalorder %s619_s5, %s443_s16  ;;  %p447_p6 = scmp.lt.u32.totalorder %s443_s16, %s619_s5 }
 0x1fa   :  { %p449_p7 = pnand %p447_p6, %p444_p5 }
 0x1fc   :  { %452 = shalt.err (!%p449_p7)
}
 0x1fd   :  { %s456_s20 = smov 128   ;;  %s457_s21 = smov 8  }
 0x1fe   :  { %277 = dma.vmem_to_hbm [thread:$0]  %s272_s15, 256, %s619_s5, [#allocation3], %s456_s20, %s456_s20, %s457_s21  }
 0x1ff   :  { %453 = dma.done.wait [#allocation3], 256  }
 0x200   :  { %454 = vsyncadd [#allocation3], 4294967040 }
 0x201   :  { %281 = vsyncpa [#allocation3], 1 }

</bundles_post_ra>
